<compile_context>
chip_gen: v7x
topology: tpu7x:2x2x1
jax: 0.10.0
libtpu: 0.0.40
codegen_flags: <defaults>
</compile_context>

<pallas_src>
import numpy as np
import jax
import jax.numpy as jnp
from jax.experimental import pallas as pl
from jax.experimental.pallas import tpu as pltpu


def _round_up(x, m):
    return ((x + m - 1) // m) * m


def rvs_kernel(slots_ref, tab_ref, out_ref, acc_ref):
    # slots_ref: (Bb, 8, NPp) f32 ; tab_ref: (Bb, 2*Pp, tV) bf16
    # out_ref  : (Bb, 1, NPp) i32 ; acc_ref: (Bb, 2*Pp, NPp) f32 accumulator
    k = pl.program_id(1)
    nk = pl.num_programs(1)

    @pl.when(k == 0)
    def _init():
        acc_ref[...] = jnp.zeros_like(acc_ref)

    Bb, twoPp, tV = tab_ref.shape
    NPp = slots_ref.shape[2]
    Pp = twoPp // 2

    slots = slots_ref[...]                                    # (Bb, 8, NPp) f32
    vox = slots[:, 0:1, :].astype(jnp.int32)                  # (Bb, 1, NPp)
    vox_safe = jnp.maximum(vox, 0)

    # One-hot over THIS tV-wide voxel chunk only; exact bf16 MXU gather of the
    # selected table columns (hi+lo digit rows, incl. the count row).
    v_base = k * tV
    iota_v = jax.lax.broadcasted_iota(jnp.int32, (Bb, tV, NPp), 1) + v_base
    onehot = (iota_v == vox_safe).astype(jnp.bfloat16)        # (Bb, tV, NPp)
    acc_ref[...] += jnp.einsum('bpv,bvn->bpn', tab_ref[...], onehot,
                               preferred_element_type=jnp.float32)

    @pl.when(k == nk - 1)
    def _finalize():
        g = acc_ref[...]                                      # (Bb, 2*Pp, NPp) f32
        # recombine base-256 digits; exact for indices/counts < 2^16
        gathered = g[:, :Pp, :] * 256.0 + g[:, Pp:, :]        # (Bb, Pp, NPp)
        cnt = jnp.maximum(gathered[:, 0:1, :], 1.0)           # (Bb, 1, NPp)
        u = slots[:, 1:2, :]                                  # (Bb, 1, NPp)
        # random slot inside the voxel: floor(u * count), clamped; +1 skips count row
        slot = jnp.minimum(jnp.floor(u * cnt), cnt - 1.0).astype(jnp.int32) + 1
        iota_p = jax.lax.broadcasted_iota(jnp.int32, (Bb, Pp, NPp), 1)
        mask = (iota_p == slot).astype(jnp.float32)
        vals = jnp.sum(gathered * mask, axis=1, keepdims=True).astype(jnp.int32)
        fb = slots[:, 2:3, :].astype(jnp.int32)
        out_ref[...] = jnp.where(vox >= 0, vals, fb)


def rvs_pallas(slots, table, npoints, tV):
    """slots: (B, 8, NPp) f32 ; table: (B, 2*Pp, Vp) bf16 ; returns (B, npoints) i32."""
    B, _, NPp = slots.shape
    _, twoPp, Vp = table.shape
    assert Vp % tV == 0
    nk = Vp // tV

    # ---- batch blocking: amortize ~0.35us/step grid overhead for small tables,
    #      but keep >=2 batch steps so both v7x TensorCores get work.
    per_block_bytes = twoPp * tV * 2 + 8 * NPp * 4 + NPp * 4
    Bb = max(1, min(B, (2 << 20) // max(per_block_bytes, 1)))
    if B >= 2:
        Bb = min(Bb, max(1, B // 2))
    while B % Bb:
        Bb -= 1

    # ---- generation-aware VMEM budget (64 MiB v7x, 128 MiB v5e/v6e)
    tile_table = 2 * Bb * twoPp * tV * 2            # double-buffered bf16 table tile
    tile_slots = 2 * Bb * 8 * NPp * 4
    tile_out = 2 * Bb * 1 * NPp * 4
    acc_bytes = Bb * twoPp * NPp * 4                # f32 accumulator scratch
    temp_bytes = Bb * tV * NPp * 2 + 3 * Bb * twoPp * NPp * 4   # one-hot + finalize temps
    need = tile_table + tile_slots + tile_out + acc_bytes + temp_bytes + (6 << 20)
    try:
        cap = pltpu.get_tpu_info().vmem_capacity_bytes
    except Exception:
        cap = 64 << 20
    vmem_limit = int(min(max(need, 16 << 20), int(cap) * 3 // 4))

    cost = pl.CostEstimate(
        flops=2 * B * twoPp * Vp * NPp,
        transcendentals=0,
        bytes_accessed=int(B * twoPp * Vp * 2 + B * 8 * NPp * 4 + B * NPp * 4),
    )

    out = pl.pallas_call(
        rvs_kernel,
        out_shape=jax.ShapeDtypeStruct((B, 1, NPp), jnp.int32),
        grid_spec=pltpu.PrefetchScalarGridSpec(
            num_scalar_prefetch=0,
            grid=(B // Bb, nk),                                   # reduction axis last
            in_specs=[
                pl.BlockSpec((Bb, 8, NPp), lambda b, k: (b, 0, 0)),     # stacked slots
                pl.BlockSpec((Bb, twoPp, tV), lambda b, k: (b, 0, k)),  # table tile
                # TODO(synk): consider pipeline_mode=pl.Buffered(3) on the table spec
                # on v5e/v6e (128 MiB VMEM) when the tile DMA outlasts the per-tile matmul.
            ],
            out_specs=pl.BlockSpec((Bb, 1, NPp), lambda b, k: (b, 0, 0)),
            scratch_shapes=[pltpu.VMEM((Bb, twoPp, NPp), jnp.float32)],
        ),
        compiler_params=pltpu.CompilerParams(
            dimension_semantics=("parallel", "arbitrary"),
            vmem_limit_bytes=vmem_limit),
        cost_estimate=cost,
    )(slots, table)
    # TODO(synk): for very large voxel grids (Vp*Pp bytes >> NPp rows) switch to a
    # scalar-prefetch + manual-DMA row gather (table kept in HBM via memory_space=pl.ANY)
    # so HBM traffic drops to only the NPp selected rows and the one-hot matmul disappears.
    # TODO(synk): on v5e/v6e an int8 two-plane table + int8 one-hot (int32 accum) would be
    # exact and full-rate; not portable to v7x (fp8-only MXU), so it must be gated per chip.
    return out.reshape(B, NPp)[:, :npoints]


def build_voxel_tables(pos_np, vs, P, tV):
    """Mirror of `index_voxels` dict-of-lists as lane-dense transposed bf16 hi/lo planes.

    Returns:
      table : (B, 2*Pp, Vp) float32 with integer values in [0, 255] (exact in bf16);
              rows [0:Pp] = hi digit plane, rows [Pp:2Pp] = lo digit plane.
              Within a plane: row 0 = per-voxel counts, row 1+j = point index j.
      counts: (B, V) int32
    """
    B, N, _ = pos_np.shape
    assert N < 65536  # TODO(synk): add a third base-256 bf16 plane for N >= 2^16
    V = vs ** 3
    Pp = _round_up(P + 1, 8)
    Vp = _round_up(_round_up(V, 128), tV)
    idx_tab = np.zeros((B, Pp, Vp), dtype=np.int64)
    counts = np.zeros((B, V), dtype=np.int32)
    for b in range(B):
        q = np.clip((pos_np[b] * vs).astype(np.int32), 0, vs - 1)    # (N, 3) voxel coords
        vid = q[:, 0] * vs * vs + q[:, 1] * vs + q[:, 2]
        for p in range(N):
            v = int(vid[p])
            c = counts[b, v]
            if c < P:
                idx_tab[b, 1 + c, v] = p
                counts[b, v] = c + 1
        idx_tab[b, 0, :V] = counts[b]
    hi = (idx_tab // 256).astype(np.float32)
    lo = (idx_tab % 256).astype(np.float32)
    table = np.concatenate([hi, lo], axis=1)                          # (B, 2*Pp, Vp)
    return table, counts, Pp, Vp


def select_voxels(counts, npoints, npoints_pad, N, rng):
    """Mirror of random.sample over dict keys + random fallback fill indices."""
    B, V = counts.shape
    vox_sel = np.full((B, npoints_pad), -1, dtype=np.int32)
    fallback = np.zeros((B, npoints_pad), dtype=np.int32)
    for b in range(B):
        occ = np.nonzero(counts[b] > 0)[0]
        if npoints <= len(occ):
            chosen = rng.choice(occ, size=npoints, replace=False)
            vox_sel[b, :npoints] = chosen.astype(np.int32)
        else:
            vox_sel[b, :len(occ)] = occ.astype(np.int32)
            # TODO(synk): fallback fill indices are distinct among themselves but are not
            # de-duplicated against indices sampled from occupied voxels (the original's
            # `while index not in added` loop) because in-voxel sampling happens on-device.
            fill = rng.permutation(N)[: npoints - len(occ)]
            fallback[b, len(occ):npoints] = fill.astype(np.int32)
    return vox_sel, fallback


def build_slots(vox_sel, rand_u_np, fallback, NPp):
    """Stack vox_sel / rand_u / fallback into one (B, 8, NPp) f32 slab (one DMA per step)."""
    B = vox_sel.shape[0]
    slots = np.zeros((B, 8, NPp), dtype=np.float32)
    slots[:, 0, :] = vox_sel.astype(np.float32)   # voxel ids & point indices are exact in f32
    slots[:, 1, :] = rand_u_np
    slots[:, 2, :] = fallback.astype(np.float32)
    return slots


if __name__ == "__main__":
    # small, deterministic setup
    B, N, vs, P, npoints = 2, 64, 2, 64, 8
    key = jax.random.PRNGKey(0)
    k_pos, k_u = jax.random.split(key)

    pos = jax.random.uniform(k_pos, (B, N, 3), dtype=jnp.float32)     # (B, N, 3)
    pos_np = np.array(jax.device_get(pos))                            # writable copy
    # squeeze batch 1 into a corner so it occupies few voxels -> exercises the fallback path
    pos_np[1] = pos_np[1] * 0.4

    NPp = max(128, _round_up(npoints, 128))                           # lane-dense output width
    V = vs ** 3
    Vp0 = _round_up(V, 128)
    tV = min(512, Vp0)                                                # voxel-chunk tile width

    voxel_table, counts, Pp, Vp = build_voxel_tables(pos_np, vs, P, tV)   # dict -> tensors
    rng = np.random.default_rng(0)
    vox_sel, fallback = select_voxels(counts, npoints, NPp, N, rng)       # random.sample equiv.
    rand_u_np = np.array(jax.device_get(
        jax.random.uniform(k_u, (B, NPp), dtype=jnp.float32)))
    slots_np = build_slots(vox_sel, rand_u_np, fallback, NPp)

    centroids = rvs_pallas(
        jnp.asarray(slots_np, dtype=jnp.float32),
        jnp.asarray(voxel_table, dtype=jnp.bfloat16),   # values <= 255 -> exact in bf16
        npoints,
        tV,
    )
    centroids = jax.block_until_ready(centroids)

    # sanity: every centroid is a valid point index
    c = np.asarray(centroids)
    assert c.shape == (B, npoints)
    assert ((c >= 0) & (c < N)).all()
    print("KERNEL_OK")
</pallas_src>

<mosaic_0001>
module attributes {stable_mosaic.version = 11 : i64} {
  func.func @rvs_kernel(%arg0: i32, %arg1: i32, %arg2: memref<1x8x128xf32, #tpu.memory_space<vmem>>, %arg3: memref<1x144x128xbf16, #tpu.memory_space<vmem>>, %arg4: memref<1x1x128xi32, #tpu.memory_space<vmem>>, %arg5: memref<1x144x128xf32, #tpu.memory_space<vmem>>) attributes {dimension_semantics = [#tpu.dimension_semantics<parallel>, #tpu.dimension_semantics<arbitrary>], iteration_bounds = array<i64: 2, 1>, scalar_prefetch = 0 : i64, scratch_operands = 1 : i64, tpu.core_type = #tpu.core_type<tc>, window_params = [{transform_indices = @transform_0, window_bounds = array<i64: 1, 8, 128>}, {transform_indices = @transform_1, window_bounds = array<i64: 1, 144, 128>}, {transform_indices = @transform_2, window_bounds = array<i64: 1, 1, 128>}]} {
    %c0_i32 = arith.constant 0 : i32
    %0 = arith.cmpi eq, %arg1, %c0_i32 : i32
    %1 = arith.extui %0 : i1 to i32
    %c0_i32_0 = arith.constant 0 : i32
    %2 = arith.cmpi ne, %1, %c0_i32_0 : i32
    scf.if %2 {
      %cst_15 = arith.constant 0.000000e+00 : f32
      %25 = vector.broadcast %cst_15 : f32 to vector<1x144x128xf32>
      %c0_16 = arith.constant 0 : index
      %c0_17 = arith.constant 0 : index
      %c0_18 = arith.constant 0 : index
      %26 = vector.load %arg5[%c0_16, %c0_17, %c0_18] : memref<1x144x128xf32, #tpu.memory_space<vmem>>, vector<1x144x128xf32>
      tpu.vector_store %arg5[%c0_16, %c0_17, %c0_18], %25 {strides = array<i32>} : memref<1x144x128xf32, #tpu.memory_space<vmem>>, vector<1x144x128xf32>,
    } else {
    }
    %c0 = arith.constant 0 : index
    %c0_1 = arith.constant 0 : index
    %c0_2 = arith.constant 0 : index
    %3 = vector.load %arg2[%c0, %c0_1, %c0_2] : memref<1x8x128xf32, #tpu.memory_space<vmem>>, vector<1x8x128xf32>
    %4 = vector.extract_strided_slice %3 {offsets = [0, 0, 0], sizes = [1, 1, 128], strides = [1, 1, 1]} : vector<1x8x128xf32> to vector<1x1x128xf32>
    %5 = arith.fptosi %4 : vector<1x1x128xf32> to vector<1x1x128xi32>
    %c0_i32_3 = arith.constant 0 : i32
    %6 = vector.broadcast %c0_i32_3 : i32 to vector<1x1x128xi32>
    %7 = arith.maxsi %5, %6 : vector<1x1x128xi32>
    %c128_i32 = arith.constant 128 : i32
    %8 = arith.muli %arg1, %c128_i32 : i32
    %9 = tpu.iota {dimensions = array<i32: 1>} : vector<1x128x128xi32>
    %10 = vector.broadcast %8 : i32 to vector<1x128x128xi32>
    %11 = arith.addi %9, %10 : vector<1x128x128xi32>
    %12 = vector.broadcast %7 : vector<1x1x128xi32> to vector<1x128x128xi32>
    %13 = arith.cmpi eq, %11, %12 : vector<1x128x128xi32>
    %14 = arith.extui %13 : vector<1x128x128xi1> to vector<1x128x128xi32>
    %15 = arith.sitofp %14 : vector<1x128x128xi32> to vector<1x128x128xf32>
    %16 = arith.truncf %15 : vector<1x128x128xf32> to vector<1x128x128xbf16>
    %c0_4 = arith.constant 0 : index
    %c0_5 = arith.constant 0 : index
    %c0_6 = arith.constant 0 : index
    %17 = vector.load %arg5[%c0_4, %c0_5, %c0_6] : memref<1x144x128xf32, #tpu.memory_space<vmem>>, vector<1x144x128xf32>
    %c0_7 = arith.constant 0 : index
    %c0_8 = arith.constant 0 : index
    %c0_9 = arith.constant 0 : index
    %18 = vector.load %arg3[%c0_7, %c0_8, %c0_9] : memref<1x144x128xbf16, #tpu.memory_space<vmem>>, vector<1x144x128xbf16>
    "tpu.trace_start"() <{level = 10 : i32, message = "bpv,bvn->bpn"}> : () -> ()
    %cst = arith.constant dense<0.000000e+00> : vector<1x144x128xf32>
    %19 = tpu.matmul %18, %16, %cst {dimension_numbers = #tpu.dot_dimension_numbers<[2], [1], [1], [2], [0, 0, 0, 1, 1, 2], [0], [0]>} : vector<1x144x128xbf16>, vector<1x128x128xbf16>, vector<1x144x128xf32> -> vector<1x144x128xf32>
    "tpu.trace_stop"() : () -> ()
    %20 = arith.addf %17, %19 : vector<1x144x128xf32>
    %c0_10 = arith.constant 0 : index
    %c0_11 = arith.constant 0 : index
    %c0_12 = arith.constant 0 : index
    %21 = vector.load %arg5[%c0_10, %c0_11, %c0_12] : memref<1x144x128xf32, #tpu.memory_space<vmem>>, vector<1x144x128xf32>
    tpu.vector_store %arg5[%c0_10, %c0_11, %c0_12], %20 {strides = array<i32>} : memref<1x144x128xf32, #tpu.memory_space<vmem>>, vector<1x144x128xf32>,
    %c0_i32_13 = arith.constant 0 : i32
    %22 = arith.cmpi eq, %arg1, %c0_i32_13 : i32
    %23 = arith.extui %22 : i1 to i32
    %c0_i32_14 = arith.constant 0 : i32
    %24 = arith.cmpi ne, %23, %c0_i32_14 : i32
    scf.if %24 {
      %c0_15 = arith.constant 0 : index
      %c0_16 = arith.constant 0 : index
      %c0_17 = arith.constant 0 : index
      %25 = vector.load %arg5[%c0_15, %c0_16, %c0_17] : memref<1x144x128xf32, #tpu.memory_space<vmem>>, vector<1x144x128xf32>
      %26 = vector.extract_strided_slice %25 {offsets = [0, 0, 0], sizes = [1, 72, 128], strides = [1, 1, 1]} : vector<1x144x128xf32> to vector<1x72x128xf32>
      %cst_18 = arith.constant 2.560000e+02 : f32
      %27 = vector.broadcast %cst_18 : f32 to vector<1x72x128xf32>
      %28 = arith.mulf %26, %27 : vector<1x72x128xf32>
      %29 = vector.extract_strided_slice %25 {offsets = [0, 72, 0], sizes = [1, 72, 128], strides = [1, 1, 1]} : vector<1x144x128xf32> to vector<1x72x128xf32>
      %30 = arith.addf %28, %29 : vector<1x72x128xf32>
      %31 = vector.extract_strided_slice %30 {offsets = [0, 0, 0], sizes = [1, 1, 128], strides = [1, 1, 1]} : vector<1x72x128xf32> to vector<1x1x128xf32>
      %cst_19 = arith.constant 1.000000e+00 : f32
      %32 = vector.broadcast %cst_19 : f32 to vector<1x1x128xf32>
      %33 = arith.maximumf %31, %32 : vector<1x1x128xf32>
      %34 = vector.extract_strided_slice %3 {offsets = [0, 1, 0], sizes = [1, 1, 128], strides = [1, 1, 1]} : vector<1x8x128xf32> to vector<1x1x128xf32>
      %35 = arith.mulf %34, %33 : vector<1x1x128xf32>
      %36 = math.floor %35 : vector<1x1x128xf32>
      %cst_20 = arith.constant 1.000000e+00 : f32
      %37 = vector.broadcast %cst_20 : f32 to vector<1x1x128xf32>
      %38 = arith.subf %33, %37 : vector<1x1x128xf32>
      %39 = arith.minimumf %36, %38 : vector<1x1x128xf32>
      %40 = arith.fptosi %39 : vector<1x1x128xf32> to vector<1x1x128xi32>
      %c1_i32 = arith.constant 1 : i32
      %41 = vector.broadcast %c1_i32 : i32 to vector<1x1x128xi32>
      %42 = arith.addi %40, %41 : vector<1x1x128xi32>
      %43 = tpu.iota {dimensions = array<i32: 1>} : vector<1x72x128xi32>
      %44 = vector.broadcast %42 : vector<1x1x128xi32> to vector<1x72x128xi32>
      %45 = arith.cmpi eq, %43, %44 : vector<1x72x128xi32>
      %46 = arith.extui %45 : vector<1x72x128xi1> to vector<1x72x128xi32>
      %47 = arith.sitofp %46 : vector<1x72x128xi32> to vector<1x72x128xf32>
      %48 = arith.mulf %30, %47 : vector<1x72x128xf32>
      %cst_21 = arith.constant dense<0.000000e+00> : vector<1x128xf32>
      %49 = vector.multi_reduction <add>, %48, %cst_21 [1] : vector<1x72x128xf32> to vector<1x128xf32>
      %50 = vector.shape_cast %49 : vector<1x128xf32> to vector<1x1x128xf32>
      %51 = arith.fptosi %50 : vector<1x1x128xf32> to vector<1x1x128xi32>
      %52 = vector.extract_strided_slice %3 {offsets = [0, 2, 0], sizes = [1, 1, 128], strides = [1, 1, 1]} : vector<1x8x128xf32> to vector<1x1x128xf32>
      %53 = arith.fptosi %52 : vector<1x1x128xf32> to vector<1x1x128xi32>
      %c0_i32_22 = arith.constant 0 : i32
      %54 = vector.broadcast %c0_i32_22 : i32 to vector<1x1x128xi32>
      %55 = arith.cmpi sge, %5, %54 : vector<1x1x128xi32>
      %56 = arith.select %55, %51, %53 : vector<1x1x128xi1>, vector<1x1x128xi32>
      %c0_23 = arith.constant 0 : index
      %c0_24 = arith.constant 0 : index
      %c0_25 = arith.constant 0 : index
      %57 = vector.load %arg4[%c0_23, %c0_24, %c0_25] : memref<1x1x128xi32, #tpu.memory_space<vmem>>, vector<1x1x128xi32>
      tpu.vector_store %arg4[%c0_23, %c0_24, %c0_25], %56 {strides = array<i32>} : memref<1x1x128xi32, #tpu.memory_space<vmem>>, vector<1x1x128xi32>,
    } else {
    }
    return
  }
  func.func @transform_0(%arg0: i32, %arg1: i32) -> (i32, i32, i32) {
    %c0_i32 = arith.constant 0 : i32
    %c0_i32_0 = arith.constant 0 : i32
    %c0_i32_1 = arith.constant 0 : i32
    return %arg0, %c0_i32, %c0_i32_0 : i32, i32, i32
  }
  func.func @transform_1(%arg0: i32, %arg1: i32) -> (i32, i32, i32) {
    %c0_i32 = arith.constant 0 : i32
    %c0_i32_0 = arith.constant 0 : i32
    return %arg0, %c0_i32, %arg1 : i32, i32, i32
  }
  func.func @transform_2(%arg0: i32, %arg1: i32) -> (i32, i32, i32) {
    %c0_i32 = arith.constant 0 : i32
    %c0_i32_0 = arith.constant 0 : i32
    %c0_i32_1 = arith.constant 0 : i32
    return %arg0, %c0_i32, %c0_i32_0 : i32, i32, i32
  }
}

</mosaic_0001>

<bundles_post_ra>
// kernel: tpu_custom_call.1
= control target key start
LH: loop header
LB: loop body
LE: loop exit
PB: predicated region body
PF: predicated region fallthrough
CT: control target
= control target key end

     0   :  { %7 = vsyncpa [#allocation4], 0  ;;  %s1560_s0 = inlined_call_operand.hbm [shape: f32[2,8,128], index: 0, kind: input, shape index: {}]   ;;  %s1561_s1 = inlined_call_operand.hbm [shape: bf16[2,144,128], index: 1, kind: input, shape index: {}]   ;;  %s1562_s2 = inlined_call_operand.hbm [shape: s32[2,1,128], index: 2, kind: output, shape index: {}]  }
   0x1   :  { %9 = vsyncpa [#allocation4 + $0x1], 0 }
   0x2   :  { %10 = vsyncpa [#allocation7], 0 }
   0x3   :  { %12 = vsyncpa [#allocation7 + $0x1], 0 }
   0x4   :  { %13 = vsyncpa [#allocation5], 0 }
   0x5   :  { %15 = vsyncpa [#allocation5 + $0x1], 0  ;;  %s1198_s9 = smov 0   ;;  %s1200_s10 = smov 0  }
   0x6   :  { %s1202_s11 = smov 0   ;;  %s1204_s12 = smov 0  }
   0x7   :  { %s1206_s13 = smov 0   ;;  %s1208_s14 = smov 0  }
   0x8 LB: > { %s789_s15 = sadd.s32 4294967295, %s1173_s14   ;;  %s790_s16 = sadd.s32 4294967294, %s1173_s14   ;;  %s1173_s14 = sphi %s1208_s14, %s21_s14   ;;  %s1169_s13 = sphi %s1206_s13, %s1581_s13   ;;  %s1165_s12 = sphi %s1204_s12, %s1580_s12   ;;  %s1161_s11 = sphi %s1202_s11, %s1579_s11   ;;  %s1157_s10 = sphi %s1200_s10, %s1578_s10   ;;  %s1153_s9 = sphi %s1198_s9, %s1577_s9  }
   0x9   : > { %s33_s17 = sadd.s32 1, %s1169_s13  ;;  %s40_s18 = sadd.s32 1, %s1161_s11 }
   0xa   : > { %p35_p0 = scmp.ge.s32.totalorder %s33_s17, 2  ;;  %p47_p1 = scmp.ne.s32.totalorder %s1161_s11, %s1157_s10 }
   0xb   : > { %p48_p2 = scmp.eq.s32.totalorder %s1173_s14, 0  ;;  %p53_p3 = scmp.ne.s32.totalorder %s1157_s10, %s1153_s9 }
   0xc   : > { %s1583_s17 = smov (%p35_p0, %s33_s17), 0  ;;  %p54_p5 = scmp.eq.s32.totalorder %s789_s15, 0 }
   0xd   : > { %p1239_p4 = por %p48_p2, %p47_p1  ;;  %s37_s20 = ssub.s32 %s1169_s13, %s1583_s17 }
   0xe   : > { %p105_p6 = scmp.eq.s32.totalorder %s789_s15, 1  ;;  %p38_p7 = scmp.eq.s32.totalorder %s37_s20, 0 }
   0xf   : > { %p1245_p8 = por %p54_p5, %p53_p3  ;;  %p111_p10 = scmp.eq.s32.totalorder %s790_s16, 1 }
  0x10   : > { %p1249_p9 = por %p105_p6, %p47_p1  ;;  %p963_p13 = scmp.lt.s32.totalorder %s1173_s14, 2 }
  0x11   : > { %s1566_s21 = scalar_select %p1245_p8, 1, 0 }
  0x12   : > { %s1567_s22 = scalar_select %p1249_p9, 1, 0 }
  0x13   : > { %s1254_s23 = scalar_select %p38_p7, %s1161_s11, %s40_s18  }
  0x14   : > { %p1256_p11 = por %p111_p10, %p53_p3  ;;  %s1263_s25 = sand.u32 1, %s1161_s11  }
  0x15   : > { %s793_s26 = sshll.u32 %s1263_s25, 3  ;;  %s794_s27 = sshll.u32 %s1169_s13, 7 }
  0x16   : > { %s1568_s24 = scalar_select %p1256_p11, 1, 0 }
  0x17   : > { %s1270_s30 = scalar_lea.hbm %s1560_s0, %s794_s27  ;;  %s135_s3 = scalar_lea.vmem [#allocation3], %s793_s26 }
  0x18   : > { %s142_s4 = sshll.u32 %s135_s3, 4  ;;  %p1276_p0 = pnand %p963_p13, %p1239_p4  ;;  %s1272_s4 = int_to_ptr.vmem [resolvable:$true] %s142_s4 }
  0x19   : > { %s132_s6 = scalar_lea.sflag [#allocation4], %s1263_s25  ;;  %s1027_s7 = scalar_lea.hbm %s1270_s30, 128 }
  0x1a   : > { %p1028_p3 = scmp.ne.s32.totalorder %s1270_s30, %s1027_s7  ;;  %p1029_p5 = pneg %p1276_p0 }
  0x1b   : > { %s1032_s16 = scalar_lea.hbm %s1560_s0, 256  ;;  %p1033_p4 = scmp.lt.u32.totalorder %s1270_s30, %s1560_s0 }
  0x1c   : > { %p1030_p6 = pnand %p1029_p5, %p1028_p3  ;;  %p1034_p10 = scmp.lt.u32.totalorder %s1032_s16, %s1027_s7 }
  0x1d   : > { %p1036_p12 = scmp.lt.u32.totalorder %s1027_s7, %s1270_s30 }
  0x1e   : > { %p1031_p7 = pneg %p1030_p6  ;;  %p1035_p13 = por %p1034_p10, %p1033_p4 }
  0x20   : > { %p1037_p1 = por %p1036_p12, %p1035_p13 }
  0x22   : > { %p1038_p2 = pnand %p1037_p1, %p1031_p7 }
  0x24   : > { %1041 = shalt.err (!%p1038_p2)
}
  0x25   : > { %s1042_s20 = scalar_lea.vmem %s1272_s4, 128  ;;  %s1175_s26 = smov [#allocation3]  }
  0x26   : > { %p1043_p3 = scmp.ne.s32.totalorder %s1272_s4, %s1042_s20  ;;  %s1047_s27 = sshll.u32 %s1175_s26, 4  ;;  %s1048_s27 = int_to_ptr.vmem [resolvable:$false] %s1047_s27 }
  0x27   : > { %s1049_s28 = scalar_lea.vmem %s1048_s27, 256  ;;  %p1050_p9 = scmp.lt.s32.totalorder %s1272_s4, %s1048_s27 }
  0x28   : > { %p1045_p6 = pnand %p1043_p3, %p1029_p5  ;;  %p1051_p4 = scmp.lt.s32.totalorder %s1049_s28, %s1042_s20 }
  0x2a   : > { %p1046_p11 = pneg %p1045_p6  ;;  %p1052_p10 = por %p1051_p4, %p1050_p9 }
  0x2c   : > { %p1053_p12 = pnand %p1052_p10, %p1046_p11 }
  0x2e   : > { %1056 = shalt.err (!%p1053_p12)
}
  0x2f   : > { %955 = dma.hbm_to_vmem [thread:$0]  (!%p1276_p0), %s1270_s30, 128, %s1272_s4, %s132_s6  }
  0x30   : > { %p1570_p1 = scmp.lt.s32.totalorder %s1173_s14, 3  ;;  %p1571_p2 = scmp.ge.s32.totalorder %s1173_s14, 1 }
  0x31   : > { %s937_s3 = smul.u32 72, %s1263_s25  ;;  %s150_s30 = scalar_lea.sflag [#allocation7], %s1263_s25 }
  0x32   : > { %p1312_p7 = pnand %p1571_p2, %p1570_p1  ;;  %s938_s7 = smul.u32 1152, %s1169_s13 }
  0x33   : > { %s153_s18 = scalar_lea.vmem [#allocation6], %s937_s3  ;;  %s1062_s26 = scalar_lea.hbm %s1561_s1, 2304 }
  0x34   : > { %s1321_s16 = scalar_lea.hbm %s1561_s1, %s938_s7  ;;  %s161_s19 = sshll.u32 %s153_s18, 4  ;;  %s1323_s19 = int_to_ptr.vmem [resolvable:$true] %s161_s19 }
  0x35   : > { %s1057_s4 = scalar_lea.hbm %s1321_s16, 1152  ;;  %p1063_p3 = scmp.lt.u32.totalorder %s1321_s16, %s1561_s1 }
  0x36   : > { %p1058_p9 = scmp.ne.s32.totalorder %s1321_s16, %s1057_s4  ;;  %p1064_p6 = scmp.lt.u32.totalorder %s1062_s26, %s1057_s4 }
  0x37   : > { %p1066_p10 = scmp.lt.u32.totalorder %s1057_s4, %s1321_s16 }
  0x38   : > { %p1060_p11 = pnand %p1058_p9, %p1029_p5  ;;  %p1065_p4 = por %p1064_p6, %p1063_p3 }
  0x3a   : > { %p1061_p13 = pneg %p1060_p11  ;;  %p1067_p12 = por %p1066_p10, %p1065_p4 }
  0x3c   : > { %p1068_p1 = pnand %p1067_p12, %p1061_p13 }
  0x3e   : > { %1071 = shalt.err (!%p1068_p1)
}
  0x3f   : > { %s1072_s3 = scalar_lea.vmem %s1323_s19, 1152  ;;  %s1176_s7 = smov [#allocation6]  }
  0x40   : > { %p1073_p2 = scmp.ne.s32.totalorder %s1323_s19, %s1072_s3  ;;  %s1077_s8 = sshll.u32 %s1176_s7, 4  ;;  %s1078_s8 = int_to_ptr.vmem [resolvable:$false] %s1077_s8 }
  0x41   : > { %s1079_s15 = scalar_lea.vmem %s1078_s8, 2304  ;;  %p1080_p8 = scmp.lt.s32.totalorder %s1323_s19, %s1078_s8 }
  0x42   : > { %p1075_p9 = pnand %p1073_p2, %p1029_p5  ;;  %p1081_p3 = scmp.lt.s32.totalorder %s1079_s15, %s1072_s3 }
  0x44   : > { %p1076_p11 = pneg %p1075_p9  ;;  %p1082_p6 = por %p1081_p3, %p1080_p8 }
  0x46   : > { %p1083_p4 = pnand %p1082_p6, %p1076_p11 }
  0x48   : > { %1086 = shalt.err (!%p1083_p4)
}
  0x49   : > { %s1177_s18 = smov 64   ;;  %s1178_s4 = smov 4  }
  0x4a   : > { %958 = dma.hbm_to_vmem [thread:$0]  (!%p1276_p0), %s1321_s16, 1152, %s1323_s19, %s150_s30, %s1177_s18, %s1177_s18, %s1178_s4  }
  0x4b   : > { %173 = sbr.rel (%p1312_p7) target bundleno = 446 (0x1be), region = 28  ;;  %s1354_s6 = sand.u32 (!%p1312_p7), 1, %s1157_s10  }
  0x4c   : > { %s797_s20 = sshll.u32 (!%p1312_p7), %s1354_s6, 3  ;;  %s176_s26 = scalar_lea.sflag (!%p1312_p7), [#allocation4], %s1354_s6 }
  0x4d   : > { %s179_s27 = scalar_lea.vmem (!%p1312_p7), [#allocation3], %s797_s20  ;;  %p1573_p8 = scmp.ne.s32.totalorder (!%p1312_p7), %s1566_s21, 0 }
  0x52   : > { %1140 = dma.done.wait (%p1573_p8), %s176_s26, 128  }
  0x53   : > { %1142 = vsyncadd (%p1573_p8), %s176_s26, 4294967168  ;;  %s939_s25 = smul.u32 72, %s1354_s6  ;;  %s185_s5 = scalar_lea.sflag [#allocation7], %s1354_s6 }
  0x55   : > { %s1364_s29 = scalar_lea.vmem [#allocation6], %s939_s25 }
  0x56   : > { %1144 = dma.done.wait (%p1573_p8), %s185_s5, 1152  }
  0x57   : > { %1146 = vsyncadd (%p1573_p8), %s185_s5, 4294966144  ;;  %v1179_v0 = vmov 0.0   ;;  %v241_v1 = vlaneseq  ;;  %vm1180_vm0 = vmmov 0   ;;  %v1378_v3 = vld [vmem:[%s179_s27] sm:$0xff]  ;;  %v1181_v14 = vmov 1.0|1.0  }
  0x58   : > { %869 = vmatprep.subr.bf16.mxu0 %v1179_v0  ;;  %921 = vmatprep.subr.bf16.mxu1 %v1179_v0  ;;  %v940_v4 = vtrunc.f32 %v1378_v3  ;;  %v1018_v25 = vld [vmem:[%s1364_s29] sm:$0xff]   ;;  %v1019_v26 = vld [vmem:[%s1364_s29 + $0x28] sm:$0xff]   ;;  %v1021_v28 = vld [vmem:[%s1364_s29 + $0x30] sm:$0xff]   ;;  %s849_s21 = sshll.u32 %s1165_s12, 4  ;;  %s212_s16 = scalar_lea.vmem [#allocation8], %s1354_s6 }
  0x59   : > { %885 = vmatprep.mubr.msk.bf16.mxu0 %vm1180_vm0, %v1179_v0  ;;  %905 = vmatprep.mubr.msk.bf16.mxu1 %vm1180_vm0, %v1179_v0  ;;  %v1376_v2 = vshrl.u32 %v241_v1, 7  ;;  %v1020_v27 = vld [vmem:[%s1364_s29 + $0x8] sm:$0xff]   ;;  %v1022_v29 = vld [vmem:[%s1364_s29 + $0x10] sm:$0xff]   ;;  %v1023_v30 = vld [vmem:[%s1364_s29 + $0x38] sm:$0xff]   ;;  %s690_s19 = sshll.u32 %s212_s16, 4  ;;  %s1511_s3 = scalar_lea.hbm %s1562_s2, %s849_s21  ;;  %s1513_s19 = int_to_ptr.vmem [resolvable:$true] %s690_s19 }
  0x5a   : > { %v1381_v5 = vcvt.f32.s32 %v940_v4  ;;  %v1024_v31 = vld [vmem:[%s1364_s29 + $0x18] sm:$0xff]   ;;  %v1025_v32 = vld [vmem:[%s1364_s29 + $0x40] sm:$0xff]   ;;  %s678_s7 = scalar_lea.sflag [#allocation5], %s1354_s6  ;;  %s1087_s8 = scalar_lea.vmem %s1513_s19, 16 }
  0x5b   : > { %v277_v6 = vsub.s32 0, %v1376_v2  ;;  %v1385_v7 = vadd.s32 8, %v1376_v2  ;;  %v1388_v8 = vadd.s32 16, %v1376_v2  ;;  %v1392_v9 = vadd.s32 24, %v1376_v2  ;;  %v1026_v33 = vld [vmem:[%s1364_s29 + $0x20] sm:$0xff]   ;;  %p1088_p0 = scmp.ne.s32.totalorder %s1513_s19, %s1087_s8  ;;  %p1574_p5 = scmp.ne.s32.totalorder %s1567_s22, 0 }
  0x5c   : > { %vm238_vm1 = vcmp.gt.s32.totalorder %v1381_v5, 0  ;;  %v1398_v12 = vadd.s32 32, %v1376_v2  ;;  %v1401_v13 = vadd.s32 40, %v1376_v2  ;;  %v1418_v15 = vadd.s32 48, %v1376_v2  ;;  %s1182_s12 = smov [#allocation8]  }
  0x5d   : > { %v239_v10 = vsel %vm238_vm1, %v1381_v5, 0  ;;  %v1421_v16 = vadd.s32 56, %v1376_v2  ;;  %v1430_v17 = vadd.s32 64, %v1376_v2  ;;  %v251_v18 = vadd.s32 72, %v1376_v2  ;;  %p1089_p7 = pnand %p1088_p0, %p1574_p5  ;;  %s1091_s15 = sshll.u32 %s1182_s12, 4  ;;  %s1092_s15 = int_to_ptr.vmem [resolvable:$false] %s1091_s15 }
  0x5e   : > { %v1395_v11 = vrot.slane %v239_v10, %v277_v6  ;;  %v252_v19 = vadd.s32 80, %v1376_v2  ;;  %v253_v20 = vadd.s32 88, %v1376_v2  ;;  %v254_v21 = vadd.s32 96, %v1376_v2  ;;  %s1093_s18 = scalar_lea.vmem %s1092_s15, 32  ;;  %p1094_p10 = scmp.lt.s32.totalorder %s1513_s19, %s1092_s15 }
  0x5f   : > { %v255_v22 = vadd.s32 104, %v1376_v2  ;;  %v256_v23 = vadd.s32 112, %v1376_v2  ;;  %v257_v24 = vadd.s32 120, %v1376_v2  ;;  %p1090_p13 = pneg %p1089_p7  ;;  %p1095_p12 = scmp.lt.s32.totalorder %s1093_s18, %s1087_s8 }
  0x60   : > { %vm279_vm2 = vcmp.eq.s32.totalorder %v1376_v2, %v1395_v11  ;;  %vm280_vm3 = vcmp.eq.s32.totalorder %v1385_v7, %v1395_v11  ;;  %vm281_vm4 = vcmp.eq.s32.totalorder %v1388_v8, %v1395_v11  ;;  %vm282_vm5 = vcmp.eq.s32.totalorder %v1392_v9, %v1395_v11 }
  0x61   : > { %vm823_vm6 = vmpackc.low %vm280_vm3, %vm279_vm2  ;;  %vm283_vm8 = vcmp.eq.s32.totalorder %v1398_v12, %v1395_v11  ;;  %vm284_vm9 = vcmp.eq.s32.totalorder %v1401_v13, %v1395_v11  ;;  %vm285_vm11 = vcmp.eq.s32.totalorder %v1418_v15, %v1395_v11  ;;  %vm286_vm12 = vcmp.eq.s32.totalorder %v1421_v16, %v1395_v11  ;;  %p1096_p1 = por %p1095_p12, %p1094_p10 }
  0x62   : > { %870 = vmatpush3.bf16.msk.msra.mxu0 %vm823_vm6, %v1181_v14  ;;  %929 = vmatpush3.bf16.msk.msra.mxu1 %vm823_vm6, %v1181_v14  ;;  %vm825_vm7 = vmpackc.low %vm282_vm5, %vm281_vm4  ;;  %vm287_vm14 = vcmp.eq.s32.totalorder %v1430_v17, %v1395_v11  ;;  %vm288_vm15 = vcmp.eq.s32.totalorder %v251_v18, %v1395_v11  ;;  %vm289_vm2 = vcmp.eq.s32.totalorder %v252_v19, %v1395_v11 }
  0x63   : > { %871 = vmatprep.subr.bf16.mxu0 %v1179_v0  ;;  %922 = vmatprep.subr.bf16.mxu1 %v1179_v0  ;;  %vm827_vm10 = vmpackc.low %vm284_vm9, %vm283_vm8  ;;  %vm290_vm3 = vcmp.eq.s32.totalorder %v253_v20, %v1395_v11  ;;  %vm291_vm5 = vcmp.eq.s32.totalorder %v254_v21, %v1395_v11  ;;  %vm292_vm6 = vcmp.eq.s32.totalorder %v255_v22, %v1395_v11  ;;  %p1097_p2 = pnand %p1096_p1, %p1090_p13 }
  0x64   : > { %vm829_vm13 = vmpackc.low %vm286_vm12, %vm285_vm11  ;;  %vm293_vm8 = vcmp.eq.s32.totalorder %v256_v23, %v1395_v11  ;;  %vm294_vm9 = vcmp.eq.s32.totalorder %v257_v24, %v1395_v11 }
  0x65   : > { %vm831_vm1 = vmpackc.low %vm288_vm15, %vm287_vm14 }
  0x66   : > { %872 = vmatpush3.bf16.msk.msra.mxu0 %vm825_vm7, %v1181_v14  ;;  %930 = vmatpush3.bf16.msk.msra.mxu1 %vm825_vm7, %v1181_v14  ;;  %vm833_vm4 = vmpackc.low %vm290_vm3, %vm289_vm2 }
  0x67   : > { %873 = vmatprep.subr.bf16.mxu0 %v1179_v0  ;;  %923 = vmatprep.subr.bf16.mxu1 %v1179_v0  ;;  %vm835_vm7 = vmpackc.low %vm292_vm6, %vm291_vm5 }
  0x6a   : > { %874 = vmatpush3.bf16.msk.msra.mxu0 %vm827_vm10, %v1181_v14  ;;  %931 = vmatpush3.bf16.msk.msra.mxu1 %vm827_vm10, %v1181_v14  ;;  %vm837_vm10 = vmpackc.low %vm294_vm9, %vm293_vm8 }
  0x6b   : > { %875 = vmatprep.subr.bf16.mxu0 %v1179_v0  ;;  %924 = vmatprep.subr.bf16.mxu1 %v1179_v0 }
  0x6e   : > { %876 = vmatpush3.bf16.msk.msra.mxu0 %vm829_vm13, %v1181_v14  ;;  %932 = vmatpush3.bf16.msk.msra.mxu1 %vm829_vm13, %v1181_v14 }
  0x6f   : > { %877 = vmatprep.subr.bf16.mxu0 %v1179_v0  ;;  %925 = vmatprep.subr.bf16.mxu1 %v1179_v0 }
  0x72   : > { %878 = vmatpush3.bf16.msk.msra.mxu0 %vm831_vm1, %v1181_v14  ;;  %933 = vmatpush3.bf16.msk.msra.mxu1 %vm831_vm1, %v1181_v14 }
  0x73   : > { %879 = vmatprep.subr.bf16.mxu0 %v1179_v0  ;;  %926 = vmatprep.subr.bf16.mxu1 %v1179_v0 }
  0x76   : > { %880 = vmatpush3.bf16.msk.msra.mxu0 %vm833_vm4, %v1181_v14  ;;  %934 = vmatpush3.bf16.msk.msra.mxu1 %vm833_vm4, %v1181_v14  ;;  %vm673_vm4 = vcmp.ge.s32.totalorder %v1381_v5, 0 }
  0x77   : > { %881 = vmatprep.subr.bf16.mxu0 %v1179_v0  ;;  %927 = vmatprep.subr.bf16.mxu1 %v1179_v0 }
  0x7a   : > { %882 = vmatpush3.bf16.msk.msra.mxu0 %vm835_vm7, %v1181_v14  ;;  %935 = vmatpush3.bf16.msk.msra.mxu1 %vm835_vm7, %v1181_v14 }
  0x7b   : > { %883 = vmatprep.subr.bf16.mxu0 %v1179_v0  ;;  %928 = vmatprep.subr.bf16.mxu1 %v1179_v0 }
  0x7e   : > { %884 = vmatpush3.bf16.msk.msra.mxu0 %vm837_vm10, %v1181_v14  ;;  %936 = vmatpush3.bf16.msk.msra.mxu1 %vm837_vm10, %v1181_v14 }
  0x81   : > { %886 = vmatmul.mubr.bf16.vlgmr.msra.gmra.mrb[0].mxu0 %v1018_v25  ;;  %906 = vmatmul.mubr.bf16.vlgmr.msra.gmra.mrb[0].mxu1 %v1019_v26 }
  0x82   : > { %889 = vmatprep.mubr.msk.bf16.mxu0 %vm1180_vm0, %v1179_v0  ;;  %909 = vmatprep.mubr.msk.bf16.mxu1 %vm1180_vm0, %v1179_v0 }
  0x89   : > { %890 = vmatmul.mubr.bf16.gmra.mrb[4].mxu0 %v1020_v27  ;;  %910 = vmatmul.mubr.bf16.gmra.mrb[4].mxu1 %v1021_v28 }
  0x8a   : > { %893 = vmatprep.mubr.msk.bf16.mxu0 %vm1180_vm0, %v1179_v0  ;;  %913 = vmatprep.mubr.msk.bf16.mxu1 %vm1180_vm0, %v1179_v0 }
  0x91   : > { %894 = vmatmul.mubr.bf16.gmra.mrb[8].mxu0 %v1022_v29  ;;  %914 = vmatmul.mubr.bf16.gmra.mrb[8].mxu1 %v1023_v30 }
  0x92   : > { %897 = vmatprep.mubr.msk.bf16.mxu0 %vm1180_vm0, %v1179_v0  ;;  %917 = vmatprep.mubr.msk.bf16.mxu1 %vm1180_vm0, %v1179_v0 }
  0x99   : > { %898 = vmatmul.mubr.bf16.gmra.mrb[12].mxu0 %v1024_v31  ;;  %918 = vmatmul.mubr.bf16.gmra.mrb[12].mxu1 %v1025_v32 }
  0x9a   : > { %901 = vmatprep.mubr.msk.bf16.mxu0 %vm1180_vm0, %v1179_v0 }
  0xa1   : > { %902 = vmatmul.mubr.bf16.gmra.mrb[16].mxu0 %v1026_v33 }
 0x154   : > { %v459_v34 = vpop.f32.mrb[0].mxu0  ;;  %v499_v35 = vpop.f32.mrb[0].mxu1 }
 0x155   : > { %v887_v36 = vpop.f32.mrb[1].mxu0  ;;  %v907_v37 = vpop.f32.mrb[1].mxu1  ;;  %v587_v29 = vmul.f32 256.0, %v459_v34 }
 0x156   : > { %v462_v38 = vpop.f32.mrb[2].mxu0  ;;  %v502_v39 = vpop.f32.mrb[2].mxu1 }
 0x157   : > { %v588_v40 = vmul.f32 256.0, %v462_v38  ;;  %v888_v41 = vpop.f32.mrb[3].mxu0  ;;  %v908_v42 = vpop.f32.mrb[3].mxu1 }
 0x159   : > { %v1481_v43 = vadd.f32 %v588_v40, %v499_v35 }
 0x15c   : > { %v467_v44 = vpop.f32.mrb[4].mxu0  ;;  %v507_v45 = vpop.f32.mrb[4].mxu1 }
 0x15d   : > { %v589_v46 = vmul.f32 256.0, %v467_v44  ;;  %v891_v47 = vpop.f32.mrb[5].mxu0  ;;  %v911_v48 = vpop.f32.mrb[5].mxu1 }
 0x15e   : > { %v470_v49 = vpop.f32.mrb[6].mxu0  ;;  %v510_v50 = vpop.f32.mrb[6].mxu1  ;;  %v620_v47 = vsub.s32 1, %v1376_v2 }
 0x15f   : > { %v590_v51 = vmul.f32 256.0, %v470_v49  ;;  %v598_v52 = vadd.f32 %v589_v46, %v502_v39  ;;  %v892_v53 = vpop.f32.mrb[7].mxu0  ;;  %v912_v54 = vpop.f32.mrb[7].mxu1 }
 0x161   : > { %v599_v55 = vadd.f32 %v590_v51, %v507_v45 }
 0x164   : > { %v475_v56 = vpop.f32.mrb[8].mxu0  ;;  %v515_v57 = vpop.f32.mrb[8].mxu1 }
 0x165   : > { %v591_v58 = vmul.f32 256.0, %v475_v56  ;;  %v895_v59 = vpop.f32.mrb[9].mxu0  ;;  %v915_v60 = vpop.f32.mrb[9].mxu1 }
 0x166   : > { %v478_v61 = vpop.f32.mrb[10].mxu0  ;;  %v518_v62 = vpop.f32.mrb[10].mxu1 }
 0x167   : > { %v592_v63 = vmul.f32 256.0, %v478_v61  ;;  %v600_v1 = vadd.f32 %v591_v58, %v510_v50  ;;  %v896_v4 = vpop.f32.mrb[11].mxu0  ;;  %v916_v6 = vpop.f32.mrb[11].mxu1 }
 0x169   : > { %v601_v10 = vadd.f32 %v592_v63, %v515_v57 }
 0x16c   : > { %v483_v11 = vpop.f32.mrb[12].mxu0  ;;  %v523_v14 = vpop.f32.mrb[12].mxu1 }
 0x16d   : > { %v593_v18 = vmul.f32 256.0, %v483_v11  ;;  %v899_v19 = vpop.f32.mrb[13].mxu0  ;;  %v919_v20 = vpop.f32.mrb[13].mxu1 }
 0x16e   : > { %v486_v21 = vpop.f32.mrb[14].mxu0  ;;  %v526_v22 = vpop.f32.mrb[14].mxu1 }
 0x16f   : > { %v594_v23 = vmul.f32 256.0, %v486_v21  ;;  %v602_v24 = vadd.f32 %v593_v18, %v518_v62  ;;  %v900_v25 = vpop.f32.mrb[15].mxu0  ;;  %v920_v26 = vpop.f32.mrb[15].mxu1  ;;  %v674_v18 = vrot.slane %v1381_v5, 2 }
 0x171   : > { %v603_v27 = vadd.f32 %v594_v23, %v523_v14 }
 0x174   : > { %v491_v28 = vpop.f32.mrb[16].mxu0 }
 0x175   : > { %v595_v30 = vmul.f32 256.0, %v491_v28  ;;  %v903_v31 = vpop.f32.mrb[17].mxu0 }
 0x176   : > { %v494_v32 = vpop.f32.mrb[18].mxu0 }
 0x177   : > { %v596_v33 = vadd.f32 %v587_v29, %v494_v32  ;;  %v604_v35 = vadd.f32 %v595_v30, %v526_v22  ;;  %v904_v36 = vpop.f32.mrb[19].mxu0 }
 0x179   : > { %v605_v37 = vmax.f32 %v596_v33, 1.0 }
 0x17b   : > { %v607_v38 = vrot.slane %v605_v37, 7  ;;  %v839_v39 = vadd.f32 -1.0, %v605_v37 }
 0x17d   : > { %v609_v40 = vmul.f32 %v607_v38, %v1378_v3  ;;  %v613_v42 = vrot.slane %v839_v39, 7 }
 0x17f   : > { %v610_v41 = vfloor.f32 %v609_v40 }
 0x181   : > { %v615_v44 = vmin.f32 %v610_v41, %v613_v42 }
 0x183   : > { %v942_v45 = vtrunc.f32 %v615_v44 }
 0x185   : > { %v943_v46 = vcvt.f32.s32 %v942_v45 }
 0x187   : > { %v617_v48 = vadd.s32 1, %v943_v46 }
 0x189   : > { %v621_v34 = vrot.slane %v617_v48, %v620_v47 }
 0x18b   : > { %vm622_vm0 = vcmp.eq.s32.totalorder %v1376_v2, %v621_v34  ;;  %vm623_vm11 = vcmp.eq.s32.totalorder %v1385_v7, %v621_v34  ;;  %vm624_vm12 = vcmp.eq.s32.totalorder %v1388_v8, %v621_v34  ;;  %vm625_vm13 = vcmp.eq.s32.totalorder %v1392_v9, %v621_v34 }
 0x18c   : > { %vm626_vm14 = vcmp.eq.s32.totalorder %v1398_v12, %v621_v34  ;;  %v840_v3 = vsel %vm622_vm0, 1.0, %v1179_v0  ;;  %v841_v49 = vsel %vm623_vm11, 1.0, %v1179_v0  ;;  %v842_v50 = vsel %vm624_vm12, 1.0, %v1179_v0 }
 0x18d   : > { %v843_v51 = vsel %vm625_vm13, 1.0, %v1179_v0  ;;  %v844_v53 = vsel %vm626_vm14, 1.0, %v1179_v0  ;;  %v649_v54 = vmul.f32 %v840_v3, %v596_v33  ;;  %v650_v2 = vmul.f32 %v841_v49, %v1481_v43 }
 0x18e   : > { %v651_v7 = vmul.f32 %v842_v50, %v598_v52  ;;  %v652_v56 = vmul.f32 %v843_v51, %v599_v55  ;;  %v653_v8 = vmul.f32 %v844_v53, %v600_v1  ;;  %vm627_vm15 = vcmp.eq.s32.totalorder %v1401_v13, %v621_v34 }
 0x18f   : > { %v658_v9 = vadd.f32 %v650_v2, %v649_v54  ;;  %vm628_vm1 = vcmp.eq.s32.totalorder %v1418_v15, %v621_v34  ;;  %vm629_vm2 = vcmp.eq.s32.totalorder %v1421_v16, %v621_v34  ;;  %vm630_vm3 = vcmp.eq.s32.totalorder %v1430_v17, %v621_v34 }
 0x190   : > { %v845_v12 = vsel %vm627_vm15, 1.0, %v1179_v0  ;;  %v846_v57 = vsel %vm628_vm1, 1.0, %v1179_v0  ;;  %v847_v58 = vsel %vm629_vm2, 1.0, %v1179_v0  ;;  %v848_v43 = vsel %vm630_vm3, 1.0, %v1179_v0 }
 0x191   : > { %v659_v52 = vadd.f32 %v658_v9, %v651_v7  ;;  %v654_v55 = vmul.f32 %v845_v12, %v601_v10  ;;  %v655_v59 = vmul.f32 %v846_v57, %v602_v24  ;;  %v656_v60 = vmul.f32 %v847_v58, %v603_v27 }
 0x192   : > { %v657_v13 = vmul.f32 %v848_v43, %v604_v35 }
 0x193   : > { %v660_v15 = vadd.f32 %v659_v52, %v652_v56 }
 0x195   : > { %v661_v61 = vadd.f32 %v660_v15, %v653_v8 }
 0x197   : > { %v662_v16 = vadd.f32 %v661_v61, %v654_v55 }
 0x199   : > { %v663_v62 = vadd.f32 %v662_v16, %v655_v59 }
 0x19b   : > { %v664_v17 = vadd.f32 %v663_v62, %v656_v60 }
 0x19d   : > { %v665_v63 = vadd.f32 %v664_v17, %v657_v13 }
 0x19f   : > { %v666_v1 = vrot.slane %v665_v63, 4 }
 0x1a1   : > { %v667_v4 = vadd.f32 %v666_v1, %v665_v63 }
 0x1a3   : > { %v668_v6 = vrot.slane %v667_v4, 2 }
 0x1a5   : > { %v669_v11 = vadd.f32 %v668_v6, %v667_v4 }
 0x1a7   : > { %v670_v14 = vrot.slane %v669_v11, 1 }
 0x1a9   : > { %v671_v0 = vadd.f32 %v670_v14, %v669_v11 }
 0x1ab   : > { %v944_v10 = vtrunc.f32 %v671_v0 }
 0x1ad   : > { %v945_v19 = vcvt.f32.s32 %v944_v10 }
 0x1af   : > { %v675_v20 = vsel %vm673_vm4, %v945_v19, %v674_v18 }
 0x1b0   : > { %676 = vst [vmem:[%s212_s16] sm:$0x1] %v675_v20 }
 0x1b1   : > { %1100 = shalt.err (!%p1097_p2)
}
 0x1b2   : > { %s1101_s4 = scalar_lea.hbm %s1511_s3, 16  ;;  %s1105_s26 = scalar_lea.hbm %s1562_s2, 32 }
 0x1b3   : > { %p1102_p9 = scmp.ne.s32.totalorder %s1511_s3, %s1101_s4  ;;  %p1106_p6 = scmp.lt.u32.totalorder %s1511_s3, %s1562_s2 }
 0x1b4   : > { %p1107_p4 = scmp.lt.u32.totalorder %s1105_s26, %s1101_s4  ;;  %p1109_p0 = scmp.lt.u32.totalorder %s1101_s4, %s1511_s3 }
 0x1b5   : > { %p1103_p11 = pnand %p1102_p9, %p1574_p5 }
 0x1b6   : > { %p1108_p8 = por %p1107_p4, %p1106_p6 }
 0x1b7   : > { %p1104_p3 = pneg %p1103_p11 }
 0x1b8   : > { %p1110_p7 = por %p1109_p0, %p1108_p8 }
 0x1ba   : > { %p1111_p13 = pnand %p1110_p7, %p1104_p3 }
 0x1bc   : > { %1114 = shalt.err (!%p1111_p13)
}
 0x1bd   : > { %950 = dma.vmem_to_hbm [thread:$0]  (%p1574_p5), %s1513_s19, 16, %s1511_s3, %s678_s7  }
 0x1be PF: > { %s702_s5 = sand.u32 1, %s1153_s9   ;;  %p1575_p10 = scmp.ne.s32.totalorder %s1568_s24, 0 }
 0x1bf   : > { %p1576_p12 = scmp.ge.s32.totalorder %s1173_s14, 2  ;;  %s703_s29 = scalar_lea.sflag [#allocation5], %s702_s5 }
 0x1c1   : > { %p960_p1 = pnand %p1576_p12, %p1575_p10 }
 0x1c3   : > { %1148 = dma.done.wait (!%p960_p1), %s703_s29, 16  }
 0x1c4   : > { %1150 = vsyncadd (!%p960_p1), %s703_s29, 4294967280  ;;  %s21_s14 = sadd.s32 1, %s1173_s14   ;;  %s1577_s9 = smov %s1157_s10 }
 0x1c5   : > { %p18_p2 = scmp.ge.s32.totalorder %s21_s14, 4   ;;  %s1578_s10 = smov %s1161_s11 }
 0x1c6   : > { %s1579_s11 = smov %s1254_s23  ;;  %s1580_s12 = smov %s1169_s13 }
 0x1c7   : > { %s1581_s13 = smov %s1583_s17  ;;  %20 = sbr.rel (!%p18_p2) target bundleno = 8 (0x8), region = 94 }
 0x1ce   :  { %707 = vsyncpa [#allocation4], 1 }
 0x1cf   :  { %709 = vsyncpa [#allocation4 + $0x1], 1 }
 0x1d0   :  { %710 = vsyncpa [#allocation7], 1 }
 0x1d1   :  { %712 = vsyncpa [#allocation7 + $0x1], 1 }
 0x1d2   :  { %713 = vsyncpa [#allocation5], 1 }
 0x1d3   :  { %715 = vsyncpa [#allocation5 + $0x1], 1 }

</bundles_post_ra>
